<compile_context>
chip_gen: v6e
topology: v6e:2x2x1
jax: 0.10.0
libtpu: 0.0.40
codegen_flags: <defaults>
</compile_context>

<pallas_src>
import functools

import numpy as np

import jax
import jax.numpy as jnp
from jax.experimental import pallas as pl
from jax.experimental.pallas import tpu as pltpu

_LANES = 128           # elements per row (lane axis)
_TARGET_ROWS = 2048    # ~2 MiB of f32 logits per grid step


def _round_up(x, m):
    return (x + m - 1) // m * m


def _focal_loss_kernel(x_ref, dmat_ref, y_ref, out_ref, *,
                       alpha0, alpha1, gamma, smooth, ignore_index,
                       rows_total, needs_row_mask):
    # x: (br, 256) f32, interleaved (o0, o1) pairs; y: (br, 128) int32 labels.
    x = x_ref[...].astype(jnp.float32)
    y = y_ref[...]
    dmat = dmat_ref[...]                       # (256, 128), +1/-1/0 selector

    # d = o0 - o1, de-interleaved on the MXU (full f32 precision).
    d = jnp.dot(x, dmat, preferred_element_type=jnp.float32,
                precision=jax.lax.Precision.HIGHEST)          # (br, 128)

    keep = y != ignore_index                   # ignored -> logits zeroed
    valid_rows = None
    if needs_row_mask:                         # only traced for partial blocks
        r = jax.lax.broadcasted_iota(jnp.int32, d.shape, 0)
        valid_rows = (pl.program_id(0) * d.shape[0] + r) < rows_total
        keep = jnp.logical_and(keep, valid_rows)
    d = jnp.where(keep, d, 0.0)                # masked / OOB -> p = (0.5, 0.5)
    yc = jnp.where(y != ignore_index, y, 0)    # reference: ignored -> class 0

    # Stable 2-class softmax with a single exp: p0 = sigmoid(d), p1 = sigmoid(-d).
    e = jnp.exp(-jnp.abs(d))
    s = 1.0 + e
    r0 = pl.reciprocal(s, approx=True)
    inv = r0 * (2.0 - s * r0)                  # one Newton step -> ~f32 exact
    pos = d >= 0.0
    p_big = inv
    p_small = e * inv
    p0 = jnp.where(pos, p_big, p_small) + smooth
    p1 = jnp.where(pos, p_small, p_big) + smooth

    # Only the labelled class' log term survives -> one log per element.
    is1 = yc == 1
    p_sel = jnp.where(is1, p1, p0)             # prob of the labelled class
    p_oth = jnp.where(is1, p0, p1)
    a_sel = jnp.where(is1, alpha1, alpha0)
    valid = jnp.logical_or(yc == 0, is1)       # pad labels (==2) drop out
    if valid_rows is not None:
        valid = jnp.logical_and(valid, valid_rows)

    if gamma == 2.0:                           # static python check
        pw = p_oth * p_oth
    elif gamma == 1.0:
        pw = p_oth
    elif gamma == 0.0:
        pw = jnp.ones_like(p_oth)
    else:
        pw = jnp.power(p_oth, gamma)

    loss = -(a_sel * pw * jnp.where(valid, jnp.log(p_sel), 0.0))

    # One partial sum per grid step -> grid axis can be "parallel".
    out_ref[0, 0] = jnp.sum(loss)


@functools.partial(
    jax.jit,
    static_argnames=("alpha", "gamma", "ignore_index", "smooth", "block_rows_target"))
def focal_loss(output, y, *, alpha=(0.1, 0.9), gamma=2.0, ignore_index=-100,
               smooth=1e-6, block_rows_target=_TARGET_ROWS):
    """Pallas implementation of FocalLoss.forward with reduction='mean'."""
    N, S, C = output.shape
    assert C == 2, "FocalLoss here is binary (2 classes)"
    E = N * S
    L = _LANES

    x_flat = output.reshape(E * 2)                 # free: class dim is minormost
    y_flat = y.reshape(E).astype(jnp.int32)        # no-op if already int32

    # Pad the element count to a multiple of 128 lanes (rare; pads contribute 0).
    E_pad = _round_up(E, L)
    if E_pad != E:
        pad_label = 2 if ignore_index != 2 else 3  # neither 0/1 nor ignore_index
        x_flat = jnp.pad(x_flat, (0, 2 * (E_pad - E)))
        y_flat = jnp.pad(y_flat, (0, E_pad - E), constant_values=pad_label)

    R = E_pad // L
    x2 = x_flat.reshape(R, 2 * L)                  # interleaved (o0, o1) pairs
    y2 = y_flat.reshape(R, L)

    if R <= block_rows_target:
        block_rows, G = R, 1                       # full-dim block (always legal)
    else:
        block_rows, G = block_rows_target, pl.cdiv(R, block_rows_target)

    # Constant de-interleave / difference matrix: d[:, c] = x[:, 2c] - x[:, 2c+1].
    row = np.arange(2 * L)[:, None]
    col = np.arange(L)[None, :]
    dmat = jnp.asarray((row == 2 * col).astype(np.float32)
                       - (row == 2 * col + 1).astype(np.float32))

    kernel = functools.partial(
        _focal_loss_kernel,
        alpha0=float(alpha[0]), alpha1=float(alpha[1]),
        gamma=float(gamma), smooth=float(smooth),
        ignore_index=int(ignore_index),
        rows_total=R, needs_row_mask=(G * block_rows != R))

    partials = pl.pallas_call(
        kernel,
        out_shape=jax.ShapeDtypeStruct((G, 1), jnp.float32),
        grid_spec=pltpu.PrefetchScalarGridSpec(
            num_scalar_prefetch=0,
            grid=(G,),
            in_specs=[
                pl.BlockSpec((block_rows, 2 * L), lambda i: (i, 0)),
                pl.BlockSpec((2 * L, L), lambda i: (0, 0)),   # resident constant
                pl.BlockSpec((block_rows, L), lambda i: (i, 0)),
            ],
            out_specs=pl.BlockSpec((1, 1), lambda i: (i, 0),
                                   memory_space=pltpu.MemorySpace.SMEM),
        ),
        compiler_params=pltpu.CompilerParams(
            dimension_semantics=("parallel",),
            vmem_limit_bytes=32 * 1024 * 1024),
    )(x2, dmat, y2)

    return jnp.sum(partials) * (1.0 / float(E))    # reduction='mean'


def focal_loss_ref(output, y, *, alpha=(0.1, 0.9), gamma=2.0,
                   ignore_index=-100, smooth=1e-6):
    """Plain-JAX reference mirroring the PyTorch forward()."""
    mask = y != ignore_index                              # [N, S, 1]
    yc = jnp.where(mask, y, 0)
    out = output * mask.astype(output.dtype)              # broadcast over classes
    probs = jax.nn.softmax(out, axis=-1) + smooth         # [N, S, 2]
    target = jax.nn.one_hot(yc[..., 0], 2, dtype=jnp.float32)
    y0, y1 = target[..., 0], target[..., 1]
    p0, p1 = probs[..., 0], probs[..., 1]
    n1 = alpha[0] * jnp.power(p1, gamma) * (y0 * jnp.log(p0))
    n2 = alpha[1] * jnp.power(p0, gamma) * (y1 * jnp.log(p1))
    loss = -(n1 + n2)
    return jnp.mean(loss)


if __name__ == "__main__":
    key = jax.random.PRNGKey(0)
    k1, k2, k3 = jax.random.split(key, 3)

    # Case 1: even shapes (single block), with some ignore_index positions.
    N, S = 8, 128
    logits = jax.random.normal(k1, (N, S, 2), dtype=jnp.float32)
    labels = jax.random.randint(k2, (N, S, 1), 0, 2, dtype=jnp.int32)
    ign = jax.random.bernoulli(k3, 0.1, (N, S, 1))
    labels = jnp.where(ign, -100, labels)
    got = jax.block_until_ready(focal_loss(logits, labels))
    want = jax.block_until_ready(focal_loss_ref(logits, labels))
    assert jnp.allclose(got, want, rtol=1e-4, atol=1e-6), (got, want)

    # Case 2: ragged N*S (exercises the pad-to-128 path).
    N2, S2 = 4, 100
    logits2 = jax.random.normal(k1, (N2, S2, 2), dtype=jnp.float32)
    labels2 = jax.random.randint(k2, (N2, S2, 1), 0, 2, dtype=jnp.int32)
    got2 = jax.block_until_ready(focal_loss(logits2, labels2))
    want2 = jax.block_until_ready(focal_loss_ref(logits2, labels2))
    assert jnp.allclose(got2, want2, rtol=1e-4, atol=1e-6), (got2, want2)

    print("KERNEL_OK")
</pallas_src>

<mosaic_0001>
module attributes {stable_mosaic.version = 11 : i64} {
  func.func @_focal_loss_kernel(%arg0: i32, %arg1: memref<8x256xf32, #tpu.memory_space<vmem>>, %arg2: memref<256x128xf32, #tpu.memory_space<vmem>>, %arg3: memref<8x128xi32, #tpu.memory_space<vmem>>, %arg4: memref<1x1xf32, #tpu.memory_space<smem>>) attributes {dimension_semantics = [#tpu.dimension_semantics<parallel>], iteration_bounds = array<i64: 1>, scalar_prefetch = 0 : i64, scratch_operands = 0 : i64, tpu.core_type = #tpu.core_type<tc>, window_params = [{transform_indices = @transform_0, window_bounds = array<i64: 8, 256>}, {pipeline_mode = #tpu.pipeline_mode<synchronous>, transform_indices = @transform_1, window_bounds = array<i64: 256, 128>}, {transform_indices = @transform_2, window_bounds = array<i64: 8, 128>}, {transform_indices = @transform_3, window_bounds = array<i64: 1, 1>}]} {
    %c0 = arith.constant 0 : index
    %c0_0 = arith.constant 0 : index
    %0 = vector.load %arg1[%c0, %c0_0] : memref<8x256xf32, #tpu.memory_space<vmem>>, vector<8x256xf32>
    %c0_1 = arith.constant 0 : index
    %c0_2 = arith.constant 0 : index
    %1 = vector.load %arg3[%c0_1, %c0_2] : memref<8x128xi32, #tpu.memory_space<vmem>>, vector<8x128xi32>
    %c0_3 = arith.constant 0 : index
    %c0_4 = arith.constant 0 : index
    %2 = vector.load %arg2[%c0_3, %c0_4] : memref<256x128xf32, #tpu.memory_space<vmem>>, vector<256x128xf32>
    %cst = arith.constant dense<0.000000e+00> : vector<8x128xf32>
    %3 = tpu.matmul %0, %2, %cst {dimension_numbers = #tpu.dot_dimension_numbers<[1], [0], [0], [1], [0, 0, 1, 1], [], []>, precision = #tpu.contract_precision<fp32>} : vector<8x256xf32>, vector<256x128xf32>, vector<8x128xf32> -> vector<8x128xf32>
    %c-100_i32 = arith.constant -100 : i32
    %4 = vector.broadcast %c-100_i32 : i32 to vector<8x128xi32>
    %5 = arith.cmpi ne, %1, %4 : vector<8x128xi32>
    %cst_5 = arith.constant 0.000000e+00 : f32
    %6 = vector.broadcast %cst_5 : f32 to vector<8x128xf32>
    %7 = arith.select %5, %3, %6 : vector<8x128xi1>, vector<8x128xf32>
    %c-100_i32_6 = arith.constant -100 : i32
    %8 = vector.broadcast %c-100_i32_6 : i32 to vector<8x128xi32>
    %9 = arith.cmpi ne, %1, %8 : vector<8x128xi32>
    %c0_i32 = arith.constant 0 : i32
    %10 = vector.broadcast %c0_i32 : i32 to vector<8x128xi32>
    %11 = arith.select %9, %1, %10 : vector<8x128xi1>, vector<8x128xi32>
    %12 = math.absf %7 : vector<8x128xf32>
    %cst_7 = arith.constant 0.000000e+00 : f32
    %13 = vector.broadcast %cst_7 : f32 to vector<8x128xf32>
    %14 = arith.subf %13, %12 : vector<8x128xf32>
    %15 = math.exp %14 : vector<8x128xf32>
    %cst_8 = arith.constant 1.000000e+00 : f32
    %16 = vector.broadcast %cst_8 : f32 to vector<8x128xf32>
    %17 = arith.addf %16, %15 : vector<8x128xf32>
    %18 = tpu.reciprocal %17 {approx = true} : vector<8x128xf32> -> vector<8x128xf32>
    %19 = arith.mulf %17, %18 : vector<8x128xf32>
    %cst_9 = arith.constant 2.000000e+00 : f32
    %20 = vector.broadcast %cst_9 : f32 to vector<8x128xf32>
    %21 = arith.subf %20, %19 : vector<8x128xf32>
    %22 = arith.mulf %18, %21 : vector<8x128xf32>
    %cst_10 = arith.constant 0.000000e+00 : f32
    %23 = vector.broadcast %cst_10 : f32 to vector<8x128xf32>
    %24 = arith.cmpf oge, %7, %23 : vector<8x128xf32>
    %25 = arith.mulf %15, %22 : vector<8x128xf32>
    %26 = arith.select %24, %22, %25 : vector<8x128xi1>, vector<8x128xf32>
    %cst_11 = arith.constant 9.99999997E-7 : f32
    %27 = vector.broadcast %cst_11 : f32 to vector<8x128xf32>
    %28 = arith.addf %26, %27 : vector<8x128xf32>
    %29 = arith.select %24, %25, %22 : vector<8x128xi1>, vector<8x128xf32>
    %cst_12 = arith.constant 9.99999997E-7 : f32
    %30 = vector.broadcast %cst_12 : f32 to vector<8x128xf32>
    %31 = arith.addf %29, %30 : vector<8x128xf32>
    %c1_i32 = arith.constant 1 : i32
    %32 = vector.broadcast %c1_i32 : i32 to vector<8x128xi32>
    %33 = arith.cmpi eq, %11, %32 : vector<8x128xi32>
    %34 = arith.select %33, %31, %28 : vector<8x128xi1>, vector<8x128xf32>
    %35 = arith.select %33, %28, %31 : vector<8x128xi1>, vector<8x128xf32>
    %cst_13 = arith.constant 0.899999976 : f32
    %cst_14 = arith.constant 1.000000e-01 : f32
    %36 = vector.broadcast %cst_13 : f32 to vector<8x128xf32>
    %37 = vector.broadcast %cst_14 : f32 to vector<8x128xf32>
    %38 = arith.select %33, %36, %37 : vector<8x128xi1>, vector<8x128xf32>
    %c0_i32_15 = arith.constant 0 : i32
    %39 = vector.broadcast %c0_i32_15 : i32 to vector<8x128xi32>
    %40 = arith.cmpi eq, %11, %39 : vector<8x128xi32>
    %41 = arith.ori %40, %33 : vector<8x128xi1>
    %42 = arith.mulf %35, %35 : vector<8x128xf32>
    %43 = arith.mulf %38, %42 : vector<8x128xf32>
    %44 = math.log %34 : vector<8x128xf32>
    %cst_16 = arith.constant 0.000000e+00 : f32
    %45 = vector.broadcast %cst_16 : f32 to vector<8x128xf32>
    %46 = arith.select %41, %44, %45 : vector<8x128xi1>, vector<8x128xf32>
    %47 = arith.mulf %43, %46 : vector<8x128xf32>
    %cst_17 = arith.constant 0.000000e+00 : f32
    %48 = vector.broadcast %cst_17 : f32 to vector<8x128xf32>
    %49 = arith.subf %48, %47 : vector<8x128xf32>
    %50 = vector.shape_cast %49 : vector<8x128xf32> to vector<1x8x128xf32>
    %cst_18 = arith.constant dense<0.000000e+00> : vector<1xf32>
    %51 = vector.multi_reduction <add>, %50, %cst_18 [1, 2] : vector<1x8x128xf32> to vector<1xf32>
    %52 = vector.shape_cast %51 : vector<1xf32> to vector<1x1x1xf32>
    %53 = vector.extract %52[0, 0, 0] : f32 from vector<1x1x1xf32>
    %c0_19 = arith.constant 0 : index
    %c0_20 = arith.constant 0 : index
    %54 = memref.load %arg4[%c0_19, %c0_20] : memref<1x1xf32, #tpu.memory_space<smem>>
    memref.store %53, %arg4[%c0_19, %c0_20] : memref<1x1xf32, #tpu.memory_space<smem>>
    return
  }
  func.func @transform_0(%arg0: i32) -> (i32, i32) {
    %c0_i32 = arith.constant 0 : i32
    %c0_i32_0 = arith.constant 0 : i32
    return %arg0, %c0_i32 : i32, i32
  }
  func.func @transform_1(%arg0: i32) -> (i32, i32) {
    %c0_i32 = arith.constant 0 : i32
    %c0_i32_0 = arith.constant 0 : i32
    %c0_i32_1 = arith.constant 0 : i32
    return %c0_i32, %c0_i32_0 : i32, i32
  }
  func.func @transform_2(%arg0: i32) -> (i32, i32) {
    %c0_i32 = arith.constant 0 : i32
    %c0_i32_0 = arith.constant 0 : i32
    return %arg0, %c0_i32 : i32, i32
  }
  func.func @transform_3(%arg0: i32) -> (i32, i32) {
    %c0_i32 = arith.constant 0 : i32
    %c0_i32_0 = arith.constant 0 : i32
    return %arg0, %c0_i32 : i32, i32
  }
}

</mosaic_0001>

<bundles_post_ra>
// kernel: focal_loss.1
= control target key start
LH: loop header
LB: loop body
LE: loop exit
PB: predicated region body
PF: predicated region fallthrough
CT: control target
= control target key end

     0   :  { %s1933_s0 = inlined_call_operand.vmem [shape: f32[8,256], index: 0, kind: input, shape index: {}]   ;;  %s1934_s1 = inlined_call_operand.vmem [shape: f32[256,128], index: 1, kind: input, shape index: {}]   ;;  %s1935_s2 = inlined_call_operand.vmem [shape: s32[8,128], index: 2, kind: input, shape index: {}]   ;;  %s1936_s3 = inlined_call_operand.hbm [shape: f32[1,1], index: 3, kind: output, shape index: {}]  }
   0x1   :  { %v49_v0 = vld [vmem:[%s1934_s1 + $0xf8] sm:$0xff]  ;;  %v48_v2 = vld [vmem:[%s1934_s1 + $0xf0] sm:$0xff]  ;;  %v47_v7 = vld [vmem:[%s1934_s1 + $0xe8] sm:$0xff] }
   0x2   :  { %v33_v1 = vld [vmem:[%s1934_s1 + $0x78] sm:$0xff]  ;;  %v1228_v3 = vand.u32 4294901760, %v49_v0  ;;  %v1232_v5 = vand.u32 4294901760, %v48_v2  ;;  %v32_v6 = vld [vmem:[%s1934_s1 + $0x70] sm:$0xff]  ;;  %v31_v8 = vld [vmem:[%s1934_s1 + $0x68] sm:$0xff]  ;;  %v1245_v10 = vand.u32 4294901760, %v47_v7 }
   0x3   :  { %v1230_v4 = vand.u32 4294901760, %v33_v1  ;;  %v1243_v9 = vand.u32 4294901760, %v32_v6  ;;  %v1247_v11 = vand.u32 4294901760, %v31_v8  ;;  %v46_v12 = vld [vmem:[%s1934_s1 + $0xe0] sm:$0xff]  ;;  %v1258_v14 = vld [vmem:[%s1934_s1 + $0xd8] sm:$0xff]  ;;  %v1279_v20 = vld [vmem:[%s1934_s1 + $0xd0] sm:$0xff] }
   0x4   :  { %v30_v13 = vld [vmem:[%s1934_s1 + $0x60] sm:$0xff]  ;;  %967 = vmatprep.subr.mxu0 %v1228_v3  ;;  %v1261_v15 = vand.u32 4294901760, %v46_v12  ;;  %v1266_v17 = vand.u32 4294901760, %v1258_v14  ;;  %v1269_v18 = vsub.f32 %v49_v0, %v1228_v3  ;;  %v1274_v19 = vld [vmem:[%s1934_s1 + $0x58] sm:$0xff]  ;;  %v1284_v21 = vld [vmem:[%s1934_s1 + $0x50] sm:$0xff]  ;;  %v1294_v24 = vand.u32 4294901760, %v1279_v20 }
   0x5   :  { %v1263_v16 = vand.u32 4294901760, %v30_v13  ;;  %968 = vmatpush3.msra.mxu0 %v1230_v4  ;;  %v1288_v22 = vand.u32 4294901760, %v1274_v19  ;;  %v1291_v23 = vsub.f32 %v33_v1, %v1230_v4  ;;  %v1297_v25 = vsub.f32 %v48_v2, %v1232_v5  ;;  %v1302_v26 = vld [vmem:[%s1934_s1 + $0xc8] sm:$0xff]  ;;  %v1312_v28 = vld [vmem:[%s1934_s1 + $0xc0] sm:$0xff]  ;;  %v1364_v46 = vld [vmem:[%s1934_s1 + $0xb8] sm:$0xff] }
   0x6   :  { %v1307_v27 = vld [vmem:[%s1934_s1 + $0x48] sm:$0xff]  ;;  %969 = vmatprep.subr.mxu0 %v1232_v5  ;;  %v1950_v29 = vand.u32 4294901760, %v1269_v18  ;;  %v1317_v30 = vand.u32 4294901760, %v1284_v21  ;;  %v1320_v31 = vsub.f32 %v32_v6, %v1243_v9  ;;  %v1323_v32 = vand.u32 4294901760, %v1302_v26  ;;  %v1337_v37 = vld [vmem:[%s1934_s1 + $0x40] sm:$0xff]  ;;  %v1377_v51 = vld [vmem:[%s1934_s1 + $0x38] sm:$0xff] }
   0x7   :  { %970 = vmatpush3.msra.mxu0 %v1243_v9  ;;  %v1949_v33 = vand.u32 4294901760, %v1291_v23  ;;  %v1947_v34 = vand.u32 4294901760, %v1297_v25  ;;  %v1329_v35 = vsub.f32 %v47_v7, %v1245_v10  ;;  %v1332_v36 = vand.u32 4294901760, %v1307_v27  ;;  %v1387_v56 = vld [vmem:[%s1934_s1 + $0xb0] sm:$0xff] }
   0x8   :  { %2006 = vst [vmem:[#allocation5_spill] sm:$0xff] %v1317_v30  ;;  %2007 = vst [vmem:[#allocation6_spill] sm:$0xff] %v1323_v32  ;;  %971 = vmatprep.subr.mxu0 %v1245_v10  ;;  %v278_v38 = vsub.f32 %v1269_v18, %v1950_v29  ;;  %v1946_v39 = vand.u32 4294901760, %v1320_v31  ;;  %v1345_v40 = vsub.f32 %v31_v8, %v1247_v11  ;;  %v1348_v41 = vand.u32 4294901760, %v1312_v28  ;;  %v1402_v61 = vld [vmem:[%s1934_s1 + $0x30] sm:$0xff] }
   0x9   :  { %2008 = vst [vmem:[#allocation7_spill] sm:$0xff] %v1332_v36  ;;  %972 = vmatpush3.msra.mxu0 %v1247_v11  ;;  %v166_v42 = vsub.f32 %v1291_v23, %v1949_v33  ;;  %v285_v43 = vsub.f32 %v1297_v25, %v1947_v34  ;;  %v1944_v44 = vand.u32 4294901760, %v1329_v35  ;;  %v1359_v45 = vsub.f32 %v46_v12, %v1261_v15 }
   0xa   :  { %2009 = vst [vmem:[#allocation8_spill] sm:$0xff] %v1348_v41  ;;  %973 = vmatprep.subr.mxu0 %v1261_v15  ;;  %v279_v47 = vand.u32 4294901760, %v278_v38  ;;  %v173_v48 = vsub.f32 %v1320_v31, %v1946_v39  ;;  %v1942_v49 = vand.u32 4294901760, %v1345_v40  ;;  %v1372_v50 = vand.u32 4294901760, %v1337_v37 }
   0xb   :  { %974 = vmatpush3.msra.mxu0 %v1263_v16  ;;  %v167_v52 = vand.u32 4294901760, %v166_v42  ;;  %v286_v53 = vand.u32 4294901760, %v285_v43  ;;  %v292_v54 = vsub.f32 %v1329_v35, %v1944_v44  ;;  %v1941_v55 = vand.u32 4294901760, %v1359_v45 }
   0xc   :  { %2010 = vst [vmem:[#allocation9_spill] sm:$0xff] %v1372_v50  ;;  %975 = vmatprep.subr.mxu0 %v1266_v17  ;;  %1002 = vmatprep.subr.mxu1 %v279_v47  ;;  %v174_v57 = vand.u32 4294901760, %v173_v48  ;;  %v180_v58 = vsub.f32 %v1345_v40, %v1942_v49  ;;  %v1394_v59 = vsub.f32 %v30_v13, %v1263_v16  ;;  %v1397_v60 = vand.u32 4294901760, %v1364_v46 }
   0xe   :  { %2011 = vst [vmem:[#allocation10_spill] sm:$0xff] %v1397_v60 }
   0xf   :  { %8 = vsyncpa [#allocation3], 0  ;;  %976 = vmatpush3.msra.mxu0 %v1288_v22  ;;  %1003 = vmatpush3.msra.mxu1 %v167_v52  ;;  %v293_v62 = vand.u32 4294901760, %v292_v54  ;;  %v299_v63 = vsub.f32 %v1359_v45, %v1941_v55  ;;  %v1410_v0 = vsub.f32 %v1258_v14, %v1266_v17  ;;  %v1413_v1 = vand.u32 4294901760, %v1377_v51  ;;  %v1418_v2 = vld [vmem:[%s1934_s1 + $0xa8] sm:$0xff]  ;;  %v1511_v49 = vld [vmem:[%s1934_s1 + $0x18] sm:$0xff] }
  0x10   :  { %977 = vmatprep.subr.mxu0 %v1294_v24  ;;  %1004 = vmatprep.subr.mxu1 %v286_v53  ;;  %v181_v6 = vand.u32 4294901760, %v180_v58  ;;  %v1939_v7 = vand.u32 4294901760, %v1394_v59  ;;  %v1424_v8 = vsub.f32 %v1274_v19, %v1288_v22  ;;  %v1427_v12 = vand.u32 4294901760, %v1387_v56  ;;  %v1432_v13 = vld [vmem:[%s1934_s1 + $0x28] sm:$0xff]  ;;  %v1527_v44 = vld [vmem:[%s1934_s1 + $0x90] sm:$0xff]  ;;  %s1198_s26 = smov [#allocation2]  }
  0x11   :  { %2012 = vst [vmem:[#allocation11_spill] sm:$0xff] %v1413_v1  ;;  %978 = vmatpush3.msra.mxu0 %v1317_v30  ;;  %1005 = vmatpush3.msra.mxu1 %v174_v57  ;;  %v300_v14 = vand.u32 4294901760, %v299_v63  ;;  %v1937_v38 = vand.u32 4294901760, %v1410_v0  ;;  %v1438_v42 = vsub.f32 %v1279_v20, %v1294_v24  ;;  %v1441_v19 = vand.u32 4294901760, %v1402_v61  ;;  %v1458_v20 = vld [vmem:[%s1934_s1 + $0xa0] sm:$0xff]  ;;  %v1554_v33 = vld [vmem:[%s1934_s1 + $0x88] sm:$0xff] }
  0x12   :  { %2013 = vst [vmem:[#allocation12_spill] sm:$0xff] %v1427_v12  ;;  %979 = vmatprep.subr.mxu0 %v1323_v32  ;;  %1006 = vmatprep.subr.mxu1 %v293_v62  ;;  %v187_v43 = vsub.f32 %v1394_v59, %v1939_v7  ;;  %v1938_v47 = vand.u32 4294901760, %v1424_v8  ;;  %v1450_v48 = vsub.f32 %v1284_v21, %v1317_v30  ;;  %v1453_v52 = vand.u32 4294901760, %v1418_v2 }
  0x13   :  { %2014 = vst [vmem:[#allocation13_spill] sm:$0xff] %v1441_v19  ;;  %980 = vmatpush3.msra.mxu0 %v1332_v36  ;;  %1007 = vmatpush3.msra.mxu1 %v181_v6  ;;  %v306_v53 = vsub.f32 %v1410_v0, %v1937_v38  ;;  %v1940_v54 = vand.u32 4294901760, %v1438_v42  ;;  %v1467_v21 = vsub.f32 %v1302_v26, %v1323_v32  ;;  %v1470_v57 = vand.u32 4294901760, %v1432_v13  ;;  %v1484_v26 = vld [vmem:[%s1934_s1 + $0x20] sm:$0xff] }
  0x14   :  { %2015 = vst [vmem:[#allocation14_spill] sm:$0xff] %v1453_v52  ;;  %981 = vmatprep.subr.mxu0 %v1348_v41  ;;  %1008 = vmatprep.subr.mxu1 %v300_v14  ;;  %v188_v58 = vand.u32 4294901760, %v187_v43  ;;  %v194_v62 = vsub.f32 %v1424_v8, %v1938_v47  ;;  %v1943_v63 = vand.u32 4294901760, %v1450_v48  ;;  %v1479_v6 = vsub.f32 %v1307_v27, %v1332_v36  ;;  %v1497_v27 = vld [vmem:[%s1934_s1 + $0x98] sm:$0xff] }
  0x15   :  { %2016 = vst [vmem:[#allocation15_spill] sm:$0xff] %v1470_v57  ;;  %982 = vmatpush3.msra.mxu0 %v1372_v50  ;;  %v307_v38 = vand.u32 4294901760, %v306_v53  ;;  %v313_v14 = vsub.f32 %v1438_v42, %v1940_v54  ;;  %v1945_v43 = vand.u32 4294901760, %v1467_v21  ;;  %v1492_v47 = vand.u32 4294901760, %v1458_v20 }
  0x16   :  { %1009 = vmatpush3.msra.mxu1 %v188_v58  ;;  %983 = vmatprep.subr.mxu0 %v1397_v60  ;;  %v195_v7 = vand.u32 4294901760, %v194_v62  ;;  %v201_v53 = vsub.f32 %v1450_v48, %v1943_v63  ;;  %v1948_v54 = vand.u32 4294901760, %v1479_v6  ;;  %v1506_v55 = vsub.f32 %v1312_v28, %v1348_v41  ;;  %v15_v41 = vld [vmem:[%s1933_s0] sm:$0xff] }
  0x17   :  { %2017 = vst [vmem:[#allocation16_spill] sm:$0xff] %v1492_v47  ;;  %1010 = vmatprep.subr.mxu1 %v307_v38  ;;  %984 = vmatpush3.msra.mxu0 %v1413_v1  ;;  %v314_v58 = vand.u32 4294901760, %v313_v14  ;;  %v320_v62 = vsub.f32 %v1467_v21, %v1945_v43  ;;  %v1518_v63 = vand.u32 4294901760, %v1484_v26  ;;  %v1522_v28 = vsub.f32 %v1337_v37, %v1372_v50  ;;  %v1540_v37 = vld [vmem:[%s1934_s1 + $0x10] sm:$0xff] }
  0x18   :  { %1011 = vmatpush3.msra.mxu1 %v195_v7  ;;  %985 = vmatprep.subr.mxu0 %v1427_v12  ;;  %v202_v38 = vand.u32 4294901760, %v201_v53  ;;  %v208_v14 = vsub.f32 %v1479_v6, %v1948_v54  ;;  %v1953_v43 = vand.u32 4294901760, %v1506_v55  ;;  %v1535_v39 = vand.u32 4294901760, %v1497_v27 }
  0x19   :  { %2018 = vst [vmem:[#allocation17_spill] sm:$0xff] %v1518_v63  ;;  %1012 = vmatprep.subr.mxu1 %v314_v58  ;;  %986 = vmatpush3.msra.mxu0 %v1441_v19  ;;  %v321_v7 = vand.u32 4294901760, %v320_v62  ;;  %v1954_v53 = vand.u32 4294901760, %v1522_v28  ;;  %v1546_v34 = vsub.f32 %v1364_v46, %v1397_v60  ;;  %v1549_v54 = vand.u32 4294901760, %v1511_v49 }
  0x1a   :  { %1013 = vmatpush3.msra.mxu1 %v202_v38  ;;  %987 = vmatprep.subr.mxu0 %v1453_v52  ;;  %v209_v58 = vand.u32 4294901760, %v208_v14  ;;  %v327_v62 = vsub.f32 %v1506_v55, %v1953_v43  ;;  %v1562_v46 = vsub.f32 %v1377_v51, %v1413_v1  ;;  %v1565_v29 = vand.u32 4294901760, %v1527_v44  ;;  %v1582_v51 = vld [vmem:[%s1934_s1 + $0x8] sm:$0xff] }
  0x1b   :  { %2019 = vst [vmem:[#allocation18_spill] sm:$0xff] %v1549_v54  ;;  %1014 = vmatprep.subr.mxu1 %v321_v7  ;;  %988 = vmatpush3.msra.mxu0 %v1470_v57  ;;  %v215_v38 = vsub.f32 %v1522_v28, %v1954_v53  ;;  %v1574_v60 = vsub.f32 %v1387_v56, %v1427_v12  ;;  %v1577_v43 = vand.u32 4294901760, %v1540_v37  ;;  %v1591_v56 = vand.u32 4294901760, %v1554_v33  ;;  %v1596_v12 = vld [vmem:[%s1934_s1 + $0x80] sm:$0xff] }
  0x1c   :  { %2020 = vst [vmem:[#allocation19_spill] sm:$0xff] %v1565_v29  ;;  %1015 = vmatpush3.msra.mxu1 %v209_v58  ;;  %989 = vmatprep.subr.mxu0 %v1492_v47  ;;  %v328_v7 = vand.u32 4294901760, %v327_v62  ;;  %v1588_v14 = vsub.f32 %v1402_v61, %v1441_v19  ;;  %v2024_v1 = vand.u32 4294901760, %v1546_v34  ;;  %v1605_v61 = vsub.f32 %v1418_v2, %v1453_v52  ;;  %v1622_v2 = vld [vmem:[%s1934_s1] sm:$0xff] }
  0x1d   :  { %2021 = vst [vmem:[#allocation20_spill] sm:$0xff] %v1577_v43  ;;  %2023 = vst [vmem:[#allocation22_spill] sm:$0xff] %v1591_v56  ;;  %990 = vmatpush3.msra.mxu0 %v1518_v63  ;;  %v216_v58 = vand.u32 4294901760, %v215_v38  ;;  %v1971_v53 = vand.u32 4294901760, %v1574_v60  ;;  %v2026_v19 = vand.u32 4294901760, %v1562_v46  ;;  %v1613_v38 = vand.u32 4294901760, %v1582_v51 }
  0x1e   :  { %2022 = vst [vmem:[#allocation21_spill] sm:$0xff] %v1588_v14  ;;  %v334_v62 = vsub.f32 %v1546_v34, %v2024_v1  ;;  %2025 = vst [vmem:[#allocation23_spill] sm:$0xff] %v1605_v61  ;;  %1016 = vmatprep.subr.mxu1 %v328_v7  ;;  %991 = vmatprep.subr.mxu0 %v1535_v39  ;;  %v1617_v1 = vsub.f32 %v1432_v13, %v1470_v57  ;;  %v1630_v52 = vand.u32 4294901760, %v1596_v12  ;;  %v16_v13 = vld [vmem:[%s1933_s0 + $0x8] sm:$0xff] }
  0x1f   :  { %v222_v50 = vsub.f32 %v1562_v46, %v2026_v19  ;;  %1017 = vmatpush3.msra.mxu1 %v216_v58  ;;  %992 = vmatpush3.msra.mxu0 %v1549_v54  ;;  %v341_v19 = vsub.f32 %v1574_v60, %v1971_v53  ;;  %v2027_v58 = vand.u32 4294901760, %v1588_v14  ;;  %v1642_v53 = vsub.f32 %v1458_v20, %v1492_v47 }
  0x20   :  { %v335_v7 = vand.u32 4294901760, %v334_v62  ;;  %993 = vmatprep.subr.mxu0 %v1565_v29  ;;  %v1656_v36 = vsub.f32 %v1484_v26, %v1518_v63  ;;  %v1671_v26 = vand.u32 4294901760, %v15_v41 }
  0x21   :  { %v223_v57 = vand.u32 4294901760, %v222_v50  ;;  %v229_v62 = vsub.f32 %v1588_v14, %v2027_v58  ;;  %v342_v32 = vand.u32 4294901760, %v341_v19  ;;  %994 = vmatpush3.msra.mxu0 %v1577_v43  ;;  %v2028_v50 = vand.u32 4294901760, %v1605_v61 }
  0x22   :  { %1018 = vmatprep.subr.mxu1 %v335_v7  ;;  %v1652_v58 = vand.u32 4294901760, %v1622_v2  ;;  %995 = vmatprep.subr.mxu0 %v1591_v56  ;;  %v2029_v7 = vand.u32 4294901760, %v1617_v1  ;;  %v1982_v47 = vand.u32 4294901760, %v1642_v53  ;;  %v1663_v14 = vand.u32 4294901760, %v16_v13  ;;  %2031 = vst [vmem:[#allocation25_spill] sm:$0xff] %v1671_v26 }
  0x23   :  { %v348_v30 = vsub.f32 %v1605_v61, %v2028_v50  ;;  %1019 = vmatpush3.msra.mxu1 %v223_v57  ;;  %v230_v20 = vand.u32 4294901760, %v229_v62  ;;  %996 = vmatpush3.msra.mxu0 %v1613_v38  ;;  %v1983_v61 = vand.u32 4294901760, %v1656_v36  ;;  %v1669_v57 = vsub.f32 %v1497_v27, %v1535_v39 }
  0x24   :  { %v236_v19 = vsub.f32 %v1617_v1, %v2029_v7  ;;  %2030 = vst [vmem:[#allocation24_spill] sm:$0xff] %v1663_v14  ;;  %1020 = vmatprep.subr.mxu1 %v342_v32  ;;  %997 = vmatprep.subr.mxu0 %v1630_v52  ;;  %v355_v7 = vsub.f32 %v1642_v53, %v1982_v47 }
  0x25   :  { %v349_v50 = vand.u32 4294901760, %v348_v30  ;;  %1021 = vmatpush3.msra.mxu1 %v230_v20  ;;  %v1678_v30 = vsub.f32 %v16_v13, %v1663_v14  ;;  %v1682_v32 = vsub.f32 %v1511_v49, %v1549_v54  ;;  %998 = vmatpush3.msra.mxu0 %v1652_v58  ;;  %v243_v27 = vsub.f32 %v1656_v36, %v1983_v61 }
  0x26   :  { %v237_v62 = vand.u32 4294901760, %v236_v19  ;;  %v1690_v19 = vsub.f32 %v15_v41, %v1671_v26  ;;  %v1694_v13 = vsub.f32 %v1527_v44, %v1565_v29  ;;  %v356_v47 = vand.u32 4294901760, %v355_v7  ;;  %1037 = vmatprep.subr.mxu0 %v1269_v18  ;;  %387 = vmatprep.mubr.f32.mxu1 %v1663_v14 }
  0x27   :  { %1022 = vmatprep.subr.mxu1 %v349_v50  ;;  %v1988_v49 = vand.u32 4294901760, %v1678_v30  ;;  %v1991_v50 = vand.u32 4294901760, %v1682_v32  ;;  %v1701_v61 = vsub.f32 %v1540_v37, %v1577_v43  ;;  %v244_v20 = vand.u32 4294901760, %v243_v27 }
  0x28   :  { %1023 = vmatpush3.msra.mxu1 %v237_v62  ;;  %v2032_v41 = vand.u32 4294901760, %v1669_v57  ;;  %v2033_v62 = vand.u32 4294901760, %v1690_v19  ;;  %v2034_v14 = vand.u32 4294901760, %v1694_v13  ;;  %v1728_v43 = vsub.f32 %v1582_v51, %v1613_v38 }
  0x29   :  { %1024 = vmatprep.subr.mxu1 %v356_v47  ;;  %v149_v7 = vsub.f32 %v1678_v30, %v1988_v49  ;;  %v250_v37 = vsub.f32 %v1682_v32, %v1991_v50  ;;  %v2036_v29 = vand.u32 4294901760, %v1701_v61 }
  0x2a   :  { %v362_v54 = vsub.f32 %v1669_v57, %v2032_v41  ;;  %v1718_v41 = vsub.f32 %v1554_v33, %v1591_v56  ;;  %1025 = vmatpush3.msra.mxu1 %v244_v20  ;;  %v155_v47 = vsub.f32 %v1690_v19, %v2033_v62  ;;  %v369_v49 = vsub.f32 %v1694_v13, %v2034_v14 }
  0x2b   :  { %2035 = vst [vmem:[#allocation26_spill] sm:$0xff] %v1728_v43  ;;  %v150_v50 = vand.u32 4294901760, %v149_v7  ;;  %v251_v27 = vand.u32 4294901760, %v250_v37  ;;  %v257_v33 = vsub.f32 %v1701_v61, %v2036_v29  ;;  %v1998_v62 = vand.u32 4294901760, %v1728_v43 }
  0x2c   :  { %v363_v44 = vand.u32 4294901760, %v362_v54  ;;  %v1999_v54 = vand.u32 4294901760, %v1718_v41  ;;  %v156_v20 = vand.u32 4294901760, %v155_v47  ;;  %v370_v56 = vand.u32 4294901760, %v369_v49 }
  0x2d   :  { %v1737_v14 = vsub.f32 %v1596_v12, %v1630_v52  ;;  %151 = vmatprep.mubr.f32.mxu0 %v150_v50  ;;  %v258_v51 = vand.u32 4294901760, %v257_v33  ;;  %v1744_v29 = vsub.f32 %v1622_v2, %v1652_v58  ;;  %v264_v49 = vsub.f32 %v1728_v43, %v1998_v62  ;;  %v2039_v33 = vld [vmem:[#allocation21_spill] sm:$0xff]  ;;  %v2052_v62 = vld [vmem:[#allocation16_spill] sm:$0xff] }
  0x2e   :  { %1026 = vmatprep.subr.mxu1 %v363_v44  ;;  %v376_v7 = vsub.f32 %v1718_v41, %v1999_v54  ;;  %157 = vmatmul.mubr.f32.vlgmr.msra.gmra.mxu0 %v156_v20  ;;  %v2040_v20 = vld [vmem:[#allocation5_spill] sm:$0xff]  ;;  %v2053_v54 = vand.u32 4294901760, %v1269_v18  ;;  %v2061_v18 = vand.u32 4294901760, %v1329_v35 }
  0x2f   :  { %2037 = vst [vmem:[#allocation27_spill] sm:$0xff] %v1737_v14  ;;  %1027 = vmatpush3.msra.mxu1 %v251_v27  ;;  %2038 = vst [vmem:[#allocation28_spill] sm:$0xff] %v1744_v29  ;;  %v1997_v12 = vand.u32 4294901760, %v1737_v14  ;;  %1038 = vmatpush3.msra.mxu0 %v1291_v23  ;;  %v1996_v44 = vand.u32 4294901760, %v1744_v29  ;;  %v265_v37 = vand.u32 4294901760, %v264_v49  ;;  %v2043_v49 = vld [vmem:[#allocation7_spill] sm:$0xff] }
  0x30   :  { %1028 = vmatprep.subr.mxu1 %v370_v56  ;;  %v377_v50 = vand.u32 4294901760, %v376_v7  ;;  %1039 = vmatprep.subr.mxu0 %v1297_v25  ;;  %v2042_v7 = vld [vmem:[#allocation6_spill] sm:$0xff] }
  0x31   :  { %1029 = vmatpush3.msra.mxu1 %v258_v51  ;;  %v383_v2 = vsub.f32 %v1737_v14, %v1997_v12  ;;  %524 = vmatprep.mubr.f32.mxu0 %v1678_v30  ;;  %v271_v56 = vsub.f32 %v1744_v29, %v1996_v44  ;;  %v2041_v51 = vld [vmem:[#allocation23_spill] sm:$0xff]  ;;  %v2050_v44 = vld [vmem:[#allocation14_spill] sm:$0xff] }
  0x32   :  { %1040 = vmatpush3.msra.mxu0 %v1320_v31  ;;  %1030 = vmatprep.subr.mxu1 %v377_v50  ;;  %v2044_v50 = vld [vmem:[#allocation8_spill] sm:$0xff]  ;;  %v2051_v12 = vld [vmem:[#allocation15_spill] sm:$0xff] }
  0x33   :  { %1041 = vmatprep.subr.mxu0 %v1329_v35  ;;  %1031 = vmatpush3.msra.mxu1 %v265_v37  ;;  %v384_v27 = vand.u32 4294901760, %v383_v2  ;;  %v272_v47 = vand.u32 4294901760, %v271_v56  ;;  %v2045_v37 = vld [vmem:[#allocation9_spill] sm:$0xff]  ;;  %v2046_v2 = vld [vmem:[#allocation10_spill] sm:$0xff]  ;;  %v2047_v56 = vld [vmem:[#allocation11_spill] sm:$0xff]  ;;  %v2066_v35 = vand.u32 4294901760, %v1690_v19 }
  0x34   :  { %1042 = vmatpush3.msra.mxu0 %v1345_v40 }
  0x35   :  { %1032 = vmatprep.subr.mxu1 %v384_v27  ;;  %1043 = vmatprep.subr.mxu0 %v1359_v45  ;;  %v2048_v27 = vld [vmem:[#allocation12_spill] sm:$0xff] }
  0x36   :  { %1033 = vmatpush3.msra.mxu1 %v272_v47  ;;  %1044 = vmatpush3.msra.mxu0 %v1394_v59  ;;  %v2049_v47 = vld [vmem:[#allocation13_spill] sm:$0xff] }
  0x37   :  { %389 = vmatmul.mubr.f32.vlgmr.msra.gmra.mxu1 %v1671_v26  ;;  %1045 = vmatprep.subr.mxu0 %v1410_v0  ;;  %v2054_v26 = vld [vmem:[#allocation18_spill] sm:$0xff] }
  0x38   :  { %1072 = vmatprep.subr.mxu1 %v1228_v3  ;;  %1046 = vmatpush3.msra.mxu0 %v1424_v8 }
  0x39   :  { %1073 = vmatpush3.msra.mxu1 %v1230_v4  ;;  %1047 = vmatprep.subr.mxu0 %v1438_v42 }
  0x3a   :  { %1074 = vmatprep.subr.mxu1 %v1232_v5  ;;  %1048 = vmatpush3.msra.mxu0 %v1450_v48 }
  0x3b   :  { %1075 = vmatpush3.msra.mxu1 %v1243_v9  ;;  %1049 = vmatprep.subr.mxu0 %v1467_v21 }
  0x3c   :  { %1076 = vmatprep.subr.mxu1 %v1245_v10  ;;  %1050 = vmatpush3.msra.mxu0 %v1479_v6 }
  0x3d   :  { %1077 = vmatpush3.msra.mxu1 %v1247_v11  ;;  %1051 = vmatprep.subr.mxu0 %v1506_v55 }
  0x3e   :  { %1078 = vmatprep.subr.mxu1 %v1261_v15  ;;  %1052 = vmatpush3.msra.mxu0 %v1522_v28 }
  0x3f   :  { %1079 = vmatpush3.msra.mxu1 %v1263_v16  ;;  %1053 = vmatprep.subr.mxu0 %v1546_v34 }
  0x40   :  { %1080 = vmatprep.subr.mxu1 %v1266_v17  ;;  %1054 = vmatpush3.msra.mxu0 %v1562_v46 }
  0x41   :  { %1081 = vmatpush3.msra.mxu1 %v1288_v22  ;;  %1055 = vmatprep.subr.mxu0 %v1574_v60 }
  0x42   :  { %1082 = vmatprep.subr.mxu1 %v1294_v24  ;;  %1056 = vmatpush3.msra.mxu0 %v2039_v33 }
  0x43   :  { %1083 = vmatpush3.msra.mxu1 %v2040_v20  ;;  %1057 = vmatprep.subr.mxu0 %v2041_v51 }
  0x44   :  { %1084 = vmatprep.subr.mxu1 %v2042_v7  ;;  %1058 = vmatpush3.msra.mxu0 %v1617_v1 }
  0x45   :  { %1085 = vmatpush3.msra.mxu1 %v2043_v49  ;;  %1059 = vmatprep.subr.mxu0 %v1642_v53 }
  0x46   :  { %1086 = vmatprep.subr.mxu1 %v2044_v50  ;;  %1060 = vmatpush3.msra.mxu0 %v1656_v36 }
  0x47   :  { %1087 = vmatpush3.msra.mxu1 %v2045_v37  ;;  %1061 = vmatprep.subr.mxu0 %v1669_v57 }
  0x48   :  { %1088 = vmatprep.subr.mxu1 %v2046_v2  ;;  %1062 = vmatpush3.msra.mxu0 %v1682_v32 }
  0x49   :  { %1089 = vmatpush3.msra.mxu1 %v2047_v56  ;;  %1063 = vmatprep.subr.mxu0 %v1694_v13 }
  0x4a   :  { %1090 = vmatprep.subr.mxu1 %v2048_v27  ;;  %1064 = vmatpush3.msra.mxu0 %v1701_v61 }
  0x4b   :  { %1091 = vmatpush3.msra.mxu1 %v2049_v47  ;;  %1065 = vmatprep.subr.mxu0 %v1718_v41 }
  0x4c   :  { %1092 = vmatprep.subr.mxu1 %v2050_v44  ;;  %1066 = vmatpush3.msra.mxu0 %v1728_v43  ;;  %v2055_v43 = vand.u32 4294901760, %v1291_v23  ;;  %v2062_v23 = vand.u32 4294901760, %v1345_v40  ;;  %v2068_v40 = vand.u32 4294901760, %v1424_v8  ;;  %v2087_v8 = vand.u32 4294901760, %v1718_v41 }
  0x4d   :  { %1093 = vmatpush3.msra.mxu1 %v2051_v12  ;;  %1067 = vmatprep.subr.mxu0 %v1737_v14  ;;  %v2056_v12 = vld [vmem:[#allocation19_spill] sm:$0xff]  ;;  %v2060_v14 = vld [vmem:[#allocation22_spill] sm:$0xff] }
  0x4e   :  { %1094 = vmatprep.subr.mxu1 %v2052_v62  ;;  %1068 = vmatpush3.msra.mxu0 %v1744_v29  ;;  %v2057_v62 = vand.u32 4294901760, %v1297_v25  ;;  %v2058_v29 = vld [vmem:[#allocation20_spill] sm:$0xff]  ;;  %v2063_v25 = vand.u32 4294901760, %v1359_v45  ;;  %v2069_v45 = vand.u32 4294901760, %v1438_v42  ;;  %v2088_v42 = vld [vmem:[#allocation26_spill] sm:$0xff] }
  0x4f   :  { %1095 = vmatpush3.msra.mxu1 %v1518_v63  ;;  %527 = vmatmul.mubr.f32.vlgmr.msra.gmra.mxu0 %v1690_v19  ;;  %v2059_v63 = vand.u32 4294901760, %v1320_v31  ;;  %v2064_v31 = vand.u32 4294901760, %v1678_v30  ;;  %v2098_v30 = vld [vmem:[#allocation25_spill] sm:$0xff] }
  0x50   :  { %1096 = vmatprep.subr.mxu1 %v1535_v39  ;;  %1107 = vmatprep.subr.mxu0 %v2053_v54 }
  0x51   :  { %1097 = vmatpush3.msra.mxu1 %v2054_v26  ;;  %1108 = vmatpush3.msra.mxu0 %v2055_v43  ;;  %v2067_v43 = vand.u32 4294901760, %v1410_v0  ;;  %v2071_v0 = vand.u32 4294901760, %v1467_v21  ;;  %v2090_v21 = vld [vmem:[#allocation15_spill] sm:$0xff] }
  0x52   :  { %1098 = vmatprep.subr.mxu1 %v2056_v12  ;;  %1109 = vmatprep.subr.mxu0 %v2057_v62 }
  0x53   :  { %1099 = vmatpush3.msra.mxu1 %v2058_v29  ;;  %1110 = vmatpush3.msra.mxu0 %v2059_v63  ;;  %v2065_v63 = vand.u32 4294901760, %v1394_v59  ;;  %v2070_v59 = vand.u32 4294901760, %v1450_v48  ;;  %v2089_v48 = vand.u32 4294901760, %v2088_v42 }
  0x54   :  { %1100 = vmatprep.subr.mxu1 %v2060_v14  ;;  %1111 = vmatprep.subr.mxu0 %v2061_v18 }
  0x55   :  { %1101 = vmatpush3.msra.mxu1 %v1613_v38  ;;  %1112 = vmatpush3.msra.mxu0 %v2062_v23 }
  0x56   :  { %1102 = vmatprep.subr.mxu1 %v1630_v52  ;;  %1113 = vmatprep.subr.mxu0 %v2063_v25 }
  0x57   :  { %1103 = vmatpush3.msra.mxu1 %v1652_v58  ;;  %631 = vmatprep.mubr.f32.mxu1 %v2064_v31 }
  0x58   :  { %1114 = vmatpush3.msra.mxu0 %v2065_v63  ;;  %635 = vmatmul.mubr.f32.vlgmr.msra.gmra.mxu1 %v2066_v35 }
  0x59   :  { %1115 = vmatprep.subr.mxu0 %v2067_v43  ;;  %1142 = vmatprep.subr.mxu1 %v1228_v3  ;;  %v2072_v3 = vand.u32 4294901760, %v1479_v6  ;;  %v2091_v6 = vld [vmem:[#allocation27_spill] sm:$0xff] }
  0x5a   :  { %1116 = vmatpush3.msra.mxu0 %v2068_v40  ;;  %1143 = vmatpush3.msra.mxu1 %v1230_v4  ;;  %v2073_v4 = vand.u32 4294901760, %v1506_v55  ;;  %v2084_v55 = vand.u32 4294901760, %v1682_v32 }
  0x5b   :  { %1117 = vmatprep.subr.mxu0 %v2069_v45  ;;  %1144 = vmatprep.subr.mxu1 %v1232_v5  ;;  %v2074_v5 = vand.u32 4294901760, %v1522_v28  ;;  %v2092_v28 = vand.u32 4294901760, %v2091_v6 }
  0x5c   :  { %1118 = vmatpush3.msra.mxu0 %v2070_v59  ;;  %1145 = vmatpush3.msra.mxu1 %v1243_v9  ;;  %v2075_v9 = vand.u32 4294901760, %v1546_v34  ;;  %v2083_v34 = vand.u32 4294901760, %v1669_v57  ;;  %v2097_v57 = vld [vmem:[#allocation17_spill] sm:$0xff] }
  0x5d   :  { %1119 = vmatprep.subr.mxu0 %v2071_v0  ;;  %1146 = vmatprep.subr.mxu1 %v1245_v10  ;;  %v2076_v10 = vand.u32 4294901760, %v1562_v46  ;;  %v2094_v46 = vld [vmem:[#allocation28_spill] sm:$0xff] }
  0x5e   :  { %1120 = vmatpush3.msra.mxu0 %v2072_v3  ;;  %1147 = vmatpush3.msra.mxu1 %v1247_v11  ;;  %v2077_v11 = vand.u32 4294901760, %v1574_v60  ;;  %v2085_v60 = vand.u32 4294901760, %v1694_v13 }
  0x5f   :  { %1121 = vmatprep.subr.mxu0 %v2073_v4  ;;  %1148 = vmatprep.subr.mxu1 %v1261_v15  ;;  %v2078_v15 = vand.u32 4294901760, %v2039_v33 }
  0x60   :  { %1122 = vmatpush3.msra.mxu0 %v2074_v5  ;;  %1149 = vmatpush3.msra.mxu1 %v1263_v16  ;;  %v2079_v16 = vand.u32 4294901760, %v2041_v51 }
  0x61   :  { %1123 = vmatprep.subr.mxu0 %v2075_v9  ;;  %1150 = vmatprep.subr.mxu1 %v1266_v17  ;;  %v2080_v17 = vand.u32 4294901760, %v1617_v1  ;;  %v2096_v1 = vld [vmem:[#allocation24_spill] sm:$0xff] }
  0x62   :  { %1124 = vmatpush3.msra.mxu0 %v2076_v10  ;;  %1151 = vmatpush3.msra.mxu1 %v1288_v22  ;;  %v2081_v22 = vand.u32 4294901760, %v1642_v53  ;;  %v2093_v53 = vld [vmem:[#allocation16_spill] sm:$0xff] }
  0x63   :  { %1125 = vmatprep.subr.mxu0 %v2077_v11  ;;  %1152 = vmatprep.subr.mxu1 %v1294_v24  ;;  %v2082_v24 = vand.u32 4294901760, %v1656_v36  ;;  %v2086_v36 = vand.u32 4294901760, %v1701_v61  ;;  %v2095_v61 = vand.u32 4294901760, %v2094_v46 }
  0x64   :  { %1126 = vmatpush3.msra.mxu0 %v2078_v15  ;;  %1153 = vmatpush3.msra.mxu1 %v2040_v20  ;;  %v1197_v15 = vmov 0.1  }
  0x65   :  { %1127 = vmatprep.subr.mxu0 %v2079_v16  ;;  %1154 = vmatprep.subr.mxu1 %v2042_v7 }
  0x66   :  { %1128 = vmatpush3.msra.mxu0 %v2080_v17  ;;  %1155 = vmatpush3.msra.mxu1 %v2043_v49  ;;  %v17_v49 = vld [vmem:[%s1935_s2] sm:$0xff] }
  0x67   :  { %1129 = vmatprep.subr.mxu0 %v2081_v22  ;;  %1156 = vmatprep.subr.mxu1 %v2044_v50  ;;  %vm912_vm0 = vcmp.ne.s32.totalorder %v17_v49, 4294967196 }
  0x68   :  { %1130 = vmatpush3.msra.mxu0 %v2082_v24  ;;  %1157 = vmatpush3.msra.mxu1 %v2045_v37  ;;  %v914_v45 = vsel %vm912_vm0, %v17_v49, 0 }
  0x69   :  { %1131 = vmatprep.subr.mxu0 %v2083_v34  ;;  %1158 = vmatprep.subr.mxu1 %v2046_v2  ;;  %vm930_vm2 = vcmp.eq.s32.totalorder %v914_v45, 1  ;;  %vm934_vm3 = vcmp.eq.s32.totalorder %v914_v45, 0 }
  0x6a   :  { %1132 = vmatpush3.msra.mxu0 %v2084_v55  ;;  %1159 = vmatpush3.msra.mxu1 %v2047_v56  ;;  %v933_v16 = vsel %vm930_vm2, 0.9, %v1197_v15  ;;  %vm935_vm4 = vmor %vm934_vm3, %vm930_vm2 }
  0x6b   :  { %1133 = vmatprep.subr.mxu0 %v2085_v60  ;;  %1160 = vmatprep.subr.mxu1 %v2048_v27 }
  0x6c   :  { %1134 = vmatpush3.msra.mxu0 %v2086_v36  ;;  %1161 = vmatpush3.msra.mxu1 %v2049_v47 }
  0x6d   :  { %1135 = vmatprep.subr.mxu0 %v2087_v8  ;;  %1162 = vmatprep.subr.mxu1 %v2050_v44 }
  0x6e   :  { %1136 = vmatpush3.msra.mxu0 %v2089_v48  ;;  %1163 = vmatpush3.msra.mxu1 %v2090_v21 }
  0x6f   :  { %1137 = vmatprep.subr.mxu0 %v2092_v28  ;;  %1164 = vmatprep.subr.mxu1 %v2093_v53 }
  0x70   :  { %1138 = vmatpush3.msra.mxu0 %v2095_v61  ;;  %801 = vmatprep.mubr.f32.mxu0 %v2096_v1 }
  0x71   :  { %1165 = vmatpush3.msra.mxu1 %v2097_v57  ;;  %803 = vmatmul.mubr.f32.vlgmr.msra.gmra.mxu0 %v2098_v30 }
  0x72   :  { %1166 = vmatprep.subr.mxu1 %v1535_v39  ;;  %905 = vmatprep.mubr.f32.mxu1 %v2096_v1 }
  0x73   :  { %1167 = vmatpush3.msra.mxu1 %v2054_v26 }
  0x74   :  { %1168 = vmatprep.subr.mxu1 %v2056_v12 }
  0x75   :  { %1169 = vmatpush3.msra.mxu1 %v2058_v29 }
  0x76   :  { %1170 = vmatprep.subr.mxu1 %v2060_v14 }
  0x77   :  { %1171 = vmatpush3.msra.mxu1 %v1613_v38 }
  0x78   :  { %1172 = vmatprep.subr.mxu1 %v1630_v52 }
  0x79   :  { %1173 = vmatpush3.msra.mxu1 %v1652_v58 }
  0x7a   :  { %907 = vmatmul.mubr.f32.vlgmr.msra.gmra.mxu1 %v2098_v30 }
  0xee   :  { %v999_v32 = vpop.f32.mrf.mxu0 }
  0xf0   :  { %v1000_v39 = vpop.f32.mrf.mxu0 }
  0xf1   :  { %v1001_v44 = vadd.f32 %v1000_v39, %v999_v32 }
  0xf7   :  { %v1034_v19 = vpop.f32.mrf.mxu1 }
  0xf9   :  { %v1035_v41 = vpop.f32.mrf.mxu1 }
  0xfa   :  { %v1036_v12 = vadd.f32 %v1035_v41, %v1034_v19 }
  0xfc   :  { %v391_v38 = vadd.f32 %v1036_v12, %v1001_v44 }
 0x10f   :  { %v1069_v13 = vpop.f32.mrf.mxu0 }
 0x111   :  { %v1070_v26 = vpop.f32.mrf.mxu0 }
 0x112   :  { %v1071_v14 = vadd.f32 %v1070_v26, %v1069_v13 }
 0x114   :  { %v529_v52 = vadd.f32 %v1071_v14, %v391_v38 }
 0x118   :  { %v1104_v54 = vpop.f32.mrf.mxu1 }
 0x11a   :  { %v1105_v29 = vpop.f32.mrf.mxu1 }
 0x11b   :  { %v1106_v20 = vadd.f32 %v1105_v29, %v1104_v54 }
 0x11d   :  { %v637_v7 = vadd.f32 %v1106_v20, %v529_v52 }
 0x131   :  { %v1139_v62 = vpop.f32.mrf.mxu0 }
 0x133   :  { %v1140_v33 = vpop.f32.mrf.mxu0 }
 0x134   :  { %v1141_v51 = vadd.f32 %v1140_v33, %v1139_v62 }
 0x136   :  { %v805_v37 = vadd.f32 %v1141_v51, %v637_v7 }
 0x13a   :  { %v1174_v58 = vpop.f32.mrf.mxu1 }
 0x13c   :  { %v1175_v50 = vpop.f32.mrf.mxu1 }
 0x13d   :  { %v1176_v2 = vadd.f32 %v1175_v50, %v1174_v58 }
 0x13f   :  { %v909_v56 = vadd.f32 %v1176_v2, %v805_v37 }
 0x141   :  { %v913_v27 = vsel %vm912_vm0, %v909_v56, 0.0 }
 0x142   :  { %v915_v47 = vand.u32 2147483647, %v913_v27  ;;  %vm924_vm1 = vcmp.ge.f32.partialorder %v913_v27, 0.0 }
 0x144   :  { %v916_v18 = vsub.f32 0.0, %v915_v47 }
 0x146   :  { %v917_v23 = vmul.f32 1.442695, %v916_v18 }
 0x148   :  { %1181 = vpow2.f32 %v917_v23 }
 0x155   :  { %v1182_v25 = vpop.eup %1181 }
 0x156   :  { %v919_v31 = vadd.f32 1.0, %v1182_v25 }
 0x158   :  { %1183 = vrcp.f32 %v919_v31 }
 0x165   :  { %v1184_v63 = vpop.eup %1183 }
 0x166   :  { %v921_v35 = vmul.f32 %v1184_v63, %v919_v31 }
 0x168   :  { %v922_v43 = vsub.f32 2.0, %v921_v35 }
 0x16a   :  { %v923_v40 = vmul.f32 %v1184_v63, %v922_v43 }
 0x16c   :  { %v925_v59 = vmul.f32 %v1182_v25, %v923_v40 }
 0x16e   :  { %v926_v0 = vsel %vm924_vm1, %v923_v40, %v925_v59  ;;  %v928_v3 = vsel %vm924_vm1, %v925_v59, %v923_v40 }
 0x16f   :  { %v927_v4 = vadd.f32 1e-06, %v926_v0  ;;  %v929_v5 = vadd.f32 1e-06, %v928_v3 }
 0x171   :  { %v931_v9 = vsel %vm930_vm2, %v929_v5, %v927_v4  ;;  %v932_v10 = vsel %vm930_vm2, %v927_v4, %v929_v5 }
 0x172   :  { %1185 = vlog2.f32 %v931_v9  ;;  %v936_v11 = vmul.f32 %v932_v10, %v932_v10 }
 0x174   :  { %v937_v24 = vmul.f32 %v936_v11, %v933_v16 }
 0x17f   :  { %v1186_v17 = vpop.eup %1185 }
 0x180   :  { %v939_v22 = vmul.f32 0.6931472, %v1186_v17 }
 0x182   :  { %v940_v34 = vsel %vm935_vm4, %v939_v22, 0.0 }
 0x183   :  { %v941_v55 = vmul.f32 %v940_v34, %v937_v24 }
 0x185   :  { %v942_v60 = vsub.f32 0.0, %v941_v55 }
 0x187   :  { %943 = vadd.xlane.f32.xlu0 %v942_v60 }
 0x210   :  { %v944_v36 = vpop.xlane.xlu0 %943 }
 0x211   :  { %v945_v8 = vrot.slane %v944_v36, 4 }
 0x213   :  { %v946_v42 = vadd.f32 %v945_v8, %v944_v36 }
 0x215   :  { %v947_v48 = vrot.slane %v946_v42, 2 }
 0x217   :  { %v948_v21 = vadd.f32 %v947_v48, %v946_v42 }
 0x219   :  { %v949_v6 = vrot.slane %v948_v21, 1 }
 0x21b   :  { %v950_v28 = vadd.f32 %v949_v6, %v948_v21 }
 0x21d   :  { %1177 = vpush %v950_v28 }
 0x24e   :  { %s1178_s2 = spop %1177 }
 0x24f   :  { %953 = sst [smem:[#allocation2]] %s1178_s2 }
 0x250   :  { %961 = dma.smem_to_hbm %s1198_s26, 16, %s1936_s3, [#allocation3]  }
 0x251   :  { %1195 = dma.done.wait [#allocation3], 16  }
 0x252   :  { %1196 = vsyncadd [#allocation3], 4294967280 }
 0x253   :  { %965 = sfence }
 0x254   :  { %966 = vsyncpa [#allocation3], 1 }

</bundles_post_ra>
